<compile_context>
chip_gen: v5e
topology: v5e:2x2
jax: 0.10.0
libtpu: 0.0.40
codegen_flags: <defaults>
</compile_context>

<pallas_src>
import jax
import jax.numpy as jnp
from jax import lax
from jax.experimental import pallas as pl
from jax.experimental.pallas import tpu as pltpu

# module hyper-parameters (loss_method='huber', defaults from __init__)
EPS = 1e-10
GAMMA_COV = 0.01
HUBER_D = 5.0
MULTI_WEIGHTS = 112.5  # huber scale s

LANE = 128  # TPU lane width


def _age_loss_kernel(n_ref, y_ref, t_ref, out_ref, acc_ref):
    """grid = (2, num_tiles): pass 0 = partial sums, pass 1 = covariance."""
    p = pl.program_id(0)            # pass index
    i = pl.program_id(1)            # tile index
    num_tiles = pl.num_programs(1)

    n = n_ref[0]                    # true (unpadded) element count
    n_f = n.astype(jnp.float32)

    # Stream in native dtype; cast to f32 in-kernel for accumulation.
    y = y_ref[...].astype(jnp.float32)
    t = t_ref[...].astype(jnp.float32)
    diff = y - t                    # reused: |diff| for L1/huber, diff for vx

    @pl.when(jnp.logical_and(p == 0, i == 0))
    def _init():
        acc_ref[0] = jnp.float32(0.0)   # sum |t - y|
        acc_ref[1] = jnp.float32(0.0)   # sum huber(|t - y|)
        acc_ref[2] = jnp.float32(0.0)   # sum (y - t)
        acc_ref[3] = jnp.float32(0.0)   # sum t
        acc_ref[4] = jnp.float32(0.0)   # sum clamped covariance products

    @pl.when(p == 0)
    def _pass_sums():
        # Padded elements are zeros -> |diff| = 0 -> contribute 0 to all sums.
        dif_abs = jnp.abs(diff)
        quad = (0.5 / MULTI_WEIGHTS) * dif_abs * dif_abs
        lin = (HUBER_D / MULTI_WEIGHTS) * dif_abs - (
            0.5 * HUBER_D * HUBER_D / MULTI_WEIGHTS)
        huber = jnp.where(dif_abs < HUBER_D, quad, lin)
        acc_ref[0] += jnp.sum(dif_abs)
        acc_ref[1] += jnp.sum(huber)
        acc_ref[2] += jnp.sum(diff)
        acc_ref[3] += jnp.sum(t)

    @pl.when(p == 1)
    def _pass_cov():
        mean_dif = acc_ref[2] / n_f
        mean_t = acc_ref[3] / n_f
        vx = diff - mean_dif
        vy = t - mean_t
        cov_prod = jnp.maximum(-(vx * vy), 0.0)
        # Mask padded lanes: padding makes vx/vy nonzero, so clamp them out.
        block_rows, lane = y.shape
        row_ids = lax.broadcasted_iota(jnp.int32, (block_rows, lane), 0)
        lane_ids = lax.broadcasted_iota(jnp.int32, (block_rows, lane), 1)
        gidx = (i * block_rows + row_ids) * lane + lane_ids
        cov_prod = jnp.where(gidx < n, cov_prod, 0.0)
        acc_ref[4] += jnp.sum(cov_prod)

    @pl.when(jnp.logical_and(p == 1, i == num_tiles - 1))
    def _finalize():
        out_ref[0] = acc_ref[1] / n_f                     # huber ('loss')
        out_ref[1] = acc_ref[0] / n_f                     # L1 ('age_l1_loss')
        out_ref[2] = (GAMMA_COV * acc_ref[4] / (n_f - 1.0)) / (EPS + GAMMA_COV)


def age_loss_forward(y, t, *, block_rows=512):
    """y: (N,) predictions; t: (N, K) targets with age in t[:, 0].

    Returns the dict produced by the PyTorch module (loss_method='huber').
    """
    n = y.shape[0]
    # TODO(synk): t[:, 0] is a strided column gather over the full (N, K)
    # array in XLA; feed the age values contiguously (layout (K, N)) upstream
    # to avoid that extra HBM pass.
    t0 = t[:, 0]

    # Sublane/lane-dense zero-padded layout: (rows_padded, 128).
    rows = pl.cdiv(n, LANE)
    block_rows = max(8, (block_rows // 8) * 8)
    block_rows = min(block_rows, ((rows + 7) // 8) * 8)
    rows_padded = ((rows + block_rows - 1) // block_rows) * block_rows
    num_tiles = rows_padded // block_rows
    total = rows_padded * LANE

    def _to_slab(x):
        x = x.reshape(-1)
        if total > n:
            x = jnp.pad(x, (0, total - n))
        return x.reshape(rows_padded, LANE)

    y2 = _to_slab(y)      # native dtype; f32 cast happens inside the kernel
    t2 = _to_slab(t0)
    n_arr = jnp.array([n], dtype=jnp.int32)

    out = pl.pallas_call(
        _age_loss_kernel,
        out_shape=jax.ShapeDtypeStruct((3,), jnp.float32),
        grid_spec=pltpu.PrefetchScalarGridSpec(
            num_scalar_prefetch=1,
            grid=(2, num_tiles),
            in_specs=[
                pl.BlockSpec((block_rows, LANE), lambda p, i, n_sm: (i, 0)),
                pl.BlockSpec((block_rows, LANE), lambda p, i, n_sm: (i, 0)),
            ],
            out_specs=pl.BlockSpec(memory_space=pltpu.SMEM),
            scratch_shapes=[pltpu.SMEM((5,), jnp.float32)],
        ),
        compiler_params=pltpu.CompilerParams(
            dimension_semantics=("arbitrary", "arbitrary")),
    )(n_arr, y2, t2)

    return {
        "loss": out[0],
        "age_l1_loss": out[1],
        "loss_cov": out[2],   # already divided by (eps + gamma_cov) in-kernel
    }


def _reference(y, t):
    """Pure-JAX reference of the PyTorch semantics (huber variant)."""
    t0 = t[:, 0].astype(jnp.float32)
    yf = y.astype(jnp.float32)
    dif_abs = jnp.abs(t0 - yf)
    ref_l1 = jnp.mean(dif_abs)
    ref_huber = jnp.mean(
        jnp.where(dif_abs < HUBER_D,
                  0.5 * dif_abs ** 2 / MULTI_WEIGHTS,
                  (HUBER_D * dif_abs - 0.5 * HUBER_D ** 2) / MULTI_WEIGHTS))
    dif = yf - t0
    vx = dif - jnp.mean(dif)
    vy = t0 - jnp.mean(t0)
    ref_cov = GAMMA_COV * jnp.sum(jnp.maximum(-(vx * vy), 0.0)) / (y.shape[0] - 1)
    return ref_huber, ref_l1, ref_cov / (EPS + GAMMA_COV)


if __name__ == "__main__":
    key = jax.random.PRNGKey(0)

    # --- small case (single tile, heavy padding) ---
    k1, k2 = jax.random.split(key)
    N = 8
    y = jax.random.uniform(k1, (N,), minval=20.0, maxval=80.0, dtype=jnp.float32)
    t_age = jax.random.uniform(k2, (N,), minval=20.0, maxval=80.0, dtype=jnp.float32)
    t = jnp.stack([t_age, jnp.zeros_like(t_age)], axis=1)  # (N, 2)

    out = age_loss_forward(y, t)
    jax.block_until_ready(out)
    ref_h, ref_l1, ref_cov = _reference(y, t)
    assert jnp.allclose(out["loss"], ref_h, rtol=1e-5, atol=1e-5)
    assert jnp.allclose(out["age_l1_loss"], ref_l1, rtol=1e-5, atol=1e-5)
    assert jnp.allclose(out["loss_cov"], ref_cov, rtol=1e-5, atol=1e-5)

    # --- larger case exercising multiple tiles + padded-lane masking ---
    k3, k4 = jax.random.split(k1)
    N2 = 2500
    yb = jax.random.uniform(k3, (N2,), minval=20.0, maxval=80.0, dtype=jnp.float32)
    tb_age = jax.random.uniform(k4, (N2,), minval=20.0, maxval=80.0, dtype=jnp.float32)
    tb = jnp.stack([tb_age, jnp.zeros_like(tb_age)], axis=1)  # (N2, 2)

    out2 = age_loss_forward(yb, tb, block_rows=8)  # forces grid = (2, 3)
    jax.block_until_ready(out2)
    ref_h2, ref_l12, ref_cov2 = _reference(yb, tb)
    assert jnp.allclose(out2["loss"], ref_h2, rtol=1e-3, atol=1e-3)
    assert jnp.allclose(out2["age_l1_loss"], ref_l12, rtol=1e-3, atol=1e-3)
    assert jnp.allclose(out2["loss_cov"], ref_cov2, rtol=1e-3, atol=1e-3)

    print("KERNEL_OK")
</pallas_src>

<mosaic_0001>
module attributes {stable_mosaic.version = 11 : i64} {
  func.func @_age_loss_kernel(%arg0: i32, %arg1: i32, %arg2: memref<1xi32, #tpu.memory_space<smem>>, %arg3: memref<8x128xf32, #tpu.memory_space<vmem>>, %arg4: memref<8x128xf32, #tpu.memory_space<vmem>>, %arg5: memref<3xf32, #tpu.memory_space<smem>>, %arg6: memref<5xf32, #tpu.memory_space<smem>>) attributes {dimension_semantics = [#tpu.dimension_semantics<arbitrary>, #tpu.dimension_semantics<arbitrary>], iteration_bounds = array<i64: 2, 1>, scalar_prefetch = 1 : i64, scratch_operands = 1 : i64, tpu.core_type = #tpu.core_type<tc>, window_params = [{transform_indices = @transform_0, window_bounds = array<i64: 8, 128>}, {transform_indices = @transform_1, window_bounds = array<i64: 8, 128>}, {transform_indices = @transform_2, window_bounds = array<i64: 3>}]} {
    %c0 = arith.constant 0 : index
    %0 = memref.load %arg2[%c0] : memref<1xi32, #tpu.memory_space<smem>>
    %1 = arith.sitofp %0 : i32 to f32
    %c0_0 = arith.constant 0 : index
    %c0_1 = arith.constant 0 : index
    %2 = vector.load %arg3[%c0_0, %c0_1] : memref<8x128xf32, #tpu.memory_space<vmem>>, vector<8x128xf32>
    %c0_2 = arith.constant 0 : index
    %c0_3 = arith.constant 0 : index
    %3 = vector.load %arg4[%c0_2, %c0_3] : memref<8x128xf32, #tpu.memory_space<vmem>>, vector<8x128xf32>
    %4 = arith.subf %2, %3 : vector<8x128xf32>
    %c0_i32 = arith.constant 0 : i32
    %5 = arith.cmpi eq, %arg0, %c0_i32 : i32
    %c0_i32_4 = arith.constant 0 : i32
    %6 = arith.cmpi eq, %arg1, %c0_i32_4 : i32
    %7 = arith.andi %5, %6 : i1
    %8 = arith.extui %7 : i1 to i32
    %c0_i32_5 = arith.constant 0 : i32
    %9 = arith.cmpi ne, %8, %c0_i32_5 : i32
    scf.if %9 {
      %cst = arith.constant 0.000000e+00 : f32
      %c0_12 = arith.constant 0 : index
      %21 = memref.load %arg6[%c0_12] : memref<5xf32, #tpu.memory_space<smem>>
      memref.store %cst, %arg6[%c0_12] : memref<5xf32, #tpu.memory_space<smem>>
      %cst_13 = arith.constant 0.000000e+00 : f32
      %c1 = arith.constant 1 : index
      %22 = memref.load %arg6[%c1] : memref<5xf32, #tpu.memory_space<smem>>
      memref.store %cst_13, %arg6[%c1] : memref<5xf32, #tpu.memory_space<smem>>
      %cst_14 = arith.constant 0.000000e+00 : f32
      %c2 = arith.constant 2 : index
      %23 = memref.load %arg6[%c2] : memref<5xf32, #tpu.memory_space<smem>>
      memref.store %cst_14, %arg6[%c2] : memref<5xf32, #tpu.memory_space<smem>>
      %cst_15 = arith.constant 0.000000e+00 : f32
      %c3 = arith.constant 3 : index
      %24 = memref.load %arg6[%c3] : memref<5xf32, #tpu.memory_space<smem>>
      memref.store %cst_15, %arg6[%c3] : memref<5xf32, #tpu.memory_space<smem>>
      %cst_16 = arith.constant 0.000000e+00 : f32
      %c4 = arith.constant 4 : index
      %25 = memref.load %arg6[%c4] : memref<5xf32, #tpu.memory_space<smem>>
      memref.store %cst_16, %arg6[%c4] : memref<5xf32, #tpu.memory_space<smem>>
    } else {
    }
    %c0_i32_6 = arith.constant 0 : i32
    %10 = arith.cmpi eq, %arg0, %c0_i32_6 : i32
    %11 = arith.extui %10 : i1 to i32
    %c0_i32_7 = arith.constant 0 : i32
    %12 = arith.cmpi ne, %11, %c0_i32_7 : i32
    scf.if %12 {
      %21 = math.absf %4 : vector<8x128xf32>
      %cst = arith.constant 0.00444444455 : f32
      %22 = vector.broadcast %cst : f32 to vector<8x128xf32>
      %23 = arith.mulf %22, %21 : vector<8x128xf32>
      %24 = arith.mulf %23, %21 : vector<8x128xf32>
      %cst_12 = arith.constant 0.0444444455 : f32
      %25 = vector.broadcast %cst_12 : f32 to vector<8x128xf32>
      %26 = arith.mulf %25, %21 : vector<8x128xf32>
      %cst_13 = arith.constant 0.111111112 : f32
      %27 = vector.broadcast %cst_13 : f32 to vector<8x128xf32>
      %28 = arith.subf %26, %27 : vector<8x128xf32>
      %cst_14 = arith.constant 5.000000e+00 : f32
      %29 = vector.broadcast %cst_14 : f32 to vector<8x128xf32>
      %30 = arith.cmpf olt, %21, %29 : vector<8x128xf32>
      %31 = arith.select %30, %24, %28 : vector<8x128xi1>, vector<8x128xf32>
      %c0_15 = arith.constant 0 : index
      %32 = memref.load %arg6[%c0_15] : memref<5xf32, #tpu.memory_space<smem>>
      %33 = vector.shape_cast %21 : vector<8x128xf32> to vector<1x8x128xf32>
      %cst_16 = arith.constant dense<0.000000e+00> : vector<1xf32>
      %34 = vector.multi_reduction <add>, %33, %cst_16 [1, 2] : vector<1x8x128xf32> to vector<1xf32>
      %35 = vector.shape_cast %34 : vector<1xf32> to vector<1x1x1xf32>
      %36 = vector.extract %35[0, 0, 0] : f32 from vector<1x1x1xf32>
      %37 = arith.addf %32, %36 : f32
      %c0_17 = arith.constant 0 : index
      %38 = memref.load %arg6[%c0_17] : memref<5xf32, #tpu.memory_space<smem>>
      memref.store %37, %arg6[%c0_17] : memref<5xf32, #tpu.memory_space<smem>>
      %c1 = arith.constant 1 : index
      %39 = memref.load %arg6[%c1] : memref<5xf32, #tpu.memory_space<smem>>
      %40 = vector.shape_cast %31 : vector<8x128xf32> to vector<1x8x128xf32>
      %cst_18 = arith.constant dense<0.000000e+00> : vector<1xf32>
      %41 = vector.multi_reduction <add>, %40, %cst_18 [1, 2] : vector<1x8x128xf32> to vector<1xf32>
      %42 = vector.shape_cast %41 : vector<1xf32> to vector<1x1x1xf32>
      %43 = vector.extract %42[0, 0, 0] : f32 from vector<1x1x1xf32>
      %44 = arith.addf %39, %43 : f32
      %c1_19 = arith.constant 1 : index
      %45 = memref.load %arg6[%c1_19] : memref<5xf32, #tpu.memory_space<smem>>
      memref.store %44, %arg6[%c1_19] : memref<5xf32, #tpu.memory_space<smem>>
      %c2 = arith.constant 2 : index
      %46 = memref.load %arg6[%c2] : memref<5xf32, #tpu.memory_space<smem>>
      %47 = vector.shape_cast %4 : vector<8x128xf32> to vector<1x8x128xf32>
      %cst_20 = arith.constant dense<0.000000e+00> : vector<1xf32>
      %48 = vector.multi_reduction <add>, %47, %cst_20 [1, 2] : vector<1x8x128xf32> to vector<1xf32>
      %49 = vector.shape_cast %48 : vector<1xf32> to vector<1x1x1xf32>
      %50 = vector.extract %49[0, 0, 0] : f32 from vector<1x1x1xf32>
      %51 = arith.addf %46, %50 : f32
      %c2_21 = arith.constant 2 : index
      %52 = memref.load %arg6[%c2_21] : memref<5xf32, #tpu.memory_space<smem>>
      memref.store %51, %arg6[%c2_21] : memref<5xf32, #tpu.memory_space<smem>>
      %c3 = arith.constant 3 : index
      %53 = memref.load %arg6[%c3] : memref<5xf32, #tpu.memory_space<smem>>
      %54 = vector.shape_cast %3 : vector<8x128xf32> to vector<1x8x128xf32>
      %cst_22 = arith.constant dense<0.000000e+00> : vector<1xf32>
      %55 = vector.multi_reduction <add>, %54, %cst_22 [1, 2] : vector<1x8x128xf32> to vector<1xf32>
      %56 = vector.shape_cast %55 : vector<1xf32> to vector<1x1x1xf32>
      %57 = vector.extract %56[0, 0, 0] : f32 from vector<1x1x1xf32>
      %58 = arith.addf %53, %57 : f32
      %c3_23 = arith.constant 3 : index
      %59 = memref.load %arg6[%c3_23] : memref<5xf32, #tpu.memory_space<smem>>
      memref.store %58, %arg6[%c3_23] : memref<5xf32, #tpu.memory_space<smem>>
    } else {
    }
    %c1_i32 = arith.constant 1 : i32
    %13 = arith.cmpi eq, %arg0, %c1_i32 : i32
    %14 = arith.extui %13 : i1 to i32
    %c0_i32_8 = arith.constant 0 : i32
    %15 = arith.cmpi ne, %14, %c0_i32_8 : i32
    scf.if %15 {
      %c2 = arith.constant 2 : index
      %21 = memref.load %arg6[%c2] : memref<5xf32, #tpu.memory_space<smem>>
      %22 = arith.divf %21, %1 : f32
      %c3 = arith.constant 3 : index
      %23 = memref.load %arg6[%c3] : memref<5xf32, #tpu.memory_space<smem>>
      %24 = arith.divf %23, %1 : f32
      %25 = vector.broadcast %22 : f32 to vector<8x128xf32>
      %26 = arith.subf %4, %25 : vector<8x128xf32>
      %27 = vector.broadcast %24 : f32 to vector<8x128xf32>
      %28 = arith.subf %3, %27 : vector<8x128xf32>
      %29 = arith.mulf %26, %28 : vector<8x128xf32>
      %cst = arith.constant 0.000000e+00 : f32
      %30 = vector.broadcast %cst : f32 to vector<8x128xf32>
      %31 = arith.subf %30, %29 : vector<8x128xf32>
      %cst_12 = arith.constant 0.000000e+00 : f32
      %32 = vector.broadcast %cst_12 : f32 to vector<8x128xf32>
      %33 = arith.maximumf %31, %32 : vector<8x128xf32>
      %34 = tpu.iota {dimensions = array<i32: 0>} : vector<8x128xi32>
      %35 = tpu.iota {dimensions = array<i32: 1>} : vector<8x128xi32>
      %c8_i32 = arith.constant 8 : i32
      %36 = arith.muli %arg1, %c8_i32 : i32
      %37 = vector.broadcast %36 : i32 to vector<8x128xi32>
      %38 = arith.addi %37, %34 : vector<8x128xi32>
      %c128_i32 = arith.constant 128 : i32
      %39 = vector.broadcast %c128_i32 : i32 to vector<8x128xi32>
      %40 = arith.muli %38, %39 : vector<8x128xi32>
      %41 = arith.addi %40, %35 : vector<8x128xi32>
      %42 = vector.broadcast %0 : i32 to vector<8x128xi32>
      %43 = arith.cmpi slt, %41, %42 : vector<8x128xi32>
      %cst_13 = arith.constant 0.000000e+00 : f32
      %44 = vector.broadcast %cst_13 : f32 to vector<8x128xf32>
      %45 = arith.select %43, %33, %44 : vector<8x128xi1>, vector<8x128xf32>
      %c4 = arith.constant 4 : index
      %46 = memref.load %arg6[%c4] : memref<5xf32, #tpu.memory_space<smem>>
      %47 = vector.shape_cast %45 : vector<8x128xf32> to vector<1x8x128xf32>
      %cst_14 = arith.constant dense<0.000000e+00> : vector<1xf32>
      %48 = vector.multi_reduction <add>, %47, %cst_14 [1, 2] : vector<1x8x128xf32> to vector<1xf32>
      %49 = vector.shape_cast %48 : vector<1xf32> to vector<1x1x1xf32>
      %50 = vector.extract %49[0, 0, 0] : f32 from vector<1x1x1xf32>
      %51 = arith.addf %46, %50 : f32
      %c4_15 = arith.constant 4 : index
      %52 = memref.load %arg6[%c4_15] : memref<5xf32, #tpu.memory_space<smem>>
      memref.store %51, %arg6[%c4_15] : memref<5xf32, #tpu.memory_space<smem>>
    } else {
    }
    %c1_i32_9 = arith.constant 1 : i32
    %16 = arith.cmpi eq, %arg0, %c1_i32_9 : i32
    %c0_i32_10 = arith.constant 0 : i32
    %17 = arith.cmpi eq, %arg1, %c0_i32_10 : i32
    %18 = arith.andi %16, %17 : i1
    %19 = arith.extui %18 : i1 to i32
    %c0_i32_11 = arith.constant 0 : i32
    %20 = arith.cmpi ne, %19, %c0_i32_11 : i32
    scf.if %20 {
      %c1 = arith.constant 1 : index
      %21 = memref.load %arg6[%c1] : memref<5xf32, #tpu.memory_space<smem>>
      %22 = arith.divf %21, %1 : f32
      %c0_12 = arith.constant 0 : index
      %23 = memref.load %arg5[%c0_12] : memref<3xf32, #tpu.memory_space<smem>>
      memref.store %22, %arg5[%c0_12] : memref<3xf32, #tpu.memory_space<smem>>
      %c0_13 = arith.constant 0 : index
      %24 = memref.load %arg6[%c0_13] : memref<5xf32, #tpu.memory_space<smem>>
      %25 = arith.divf %24, %1 : f32
      %c1_14 = arith.constant 1 : index
      %26 = memref.load %arg5[%c1_14] : memref<3xf32, #tpu.memory_space<smem>>
      memref.store %25, %arg5[%c1_14] : memref<3xf32, #tpu.memory_space<smem>>
      %c4 = arith.constant 4 : index
      %27 = memref.load %arg6[%c4] : memref<5xf32, #tpu.memory_space<smem>>
      %cst = arith.constant 0.00999999977 : f32
      %28 = arith.mulf %cst, %27 : f32
      %cst_15 = arith.constant 1.000000e+00 : f32
      %29 = arith.subf %1, %cst_15 : f32
      %30 = arith.divf %28, %29 : f32
      %cst_16 = arith.constant 0.00999999977 : f32
      %31 = arith.divf %30, %cst_16 : f32
      %c2 = arith.constant 2 : index
      %32 = memref.load %arg5[%c2] : memref<3xf32, #tpu.memory_space<smem>>
      memref.store %31, %arg5[%c2] : memref<3xf32, #tpu.memory_space<smem>>
    } else {
    }
    return
  }
  func.func @transform_0(%arg0: i32, %arg1: i32, %arg2: memref<1xi32, #tpu.memory_space<smem>>) -> (i32, i32) {
    %c0_i32 = arith.constant 0 : i32
    %c0_i32_0 = arith.constant 0 : i32
    return %arg1, %c0_i32 : i32, i32
  }
  func.func @transform_1(%arg0: i32, %arg1: i32, %arg2: memref<1xi32, #tpu.memory_space<smem>>) -> (i32, i32) {
    %c0_i32 = arith.constant 0 : i32
    %c0_i32_0 = arith.constant 0 : i32
    return %arg1, %c0_i32 : i32, i32
  }
  func.func @transform_2(%arg0: i32, %arg1: i32, %arg2: memref<1xi32, #tpu.memory_space<smem>>) -> i32 {
    %c0_i32 = arith.constant 0 : i32
    %c0_i32_0 = arith.constant 0 : i32
    return %c0_i32 : i32
  }
}

</mosaic_0001>

<bundles_post_ra>
// kernel: tpu_custom_call.1
= control target key start
LH: loop header
LB: loop body
LE: loop exit
PB: predicated region body
PF: predicated region fallthrough
CT: control target
= control target key end

     0   :  { %s808_s0 = inlined_call_operand.<no memory space> [shape: s32[1], index: 0, kind: input, shape index: {}]   ;;  %s809_s1 = inlined_call_operand.hbm [shape: f32[8,128], index: 1, kind: input, shape index: {}]   ;;  %s810_s2 = inlined_call_operand.hbm [shape: f32[8,128], index: 2, kind: input, shape index: {}]   ;;  %s811_s3 = inlined_call_operand.hbm [shape: f32[3], index: 3, kind: output, shape index: {}]  }
   0x1   :  { %8 = sst [smem:[#allocation4]] %s808_s0 }
   0x2   :  { %9 = vsyncpa [#allocation6], 0 }
   0x3   :  { %10 = vsyncpa [#allocation9], 0 }
   0x4   :  { %11 = vsyncpa [#allocation7], 0  ;;  %s718_s14 = smov 0   ;;  %s720_s15 = smov 0  }
   0x5   :  { %s722_s16 = smov 0  }
   0x6 LB: > { %s468_s0 = sadd.s32 4294967295, %s688_s16   ;;  %s29_s17 = sadd.s32 1, %s684_s15  ;;  %s688_s16 = sphi %s722_s16, %s17_s16   ;;  %s684_s15 = sphi %s720_s15, %s815_s15   ;;  %s680_s14 = sphi %s718_s14, %s814_s14  }
   0x7   : > { %p31_p0 = scmp.ge.s32.totalorder %s29_s17, 2  ;;  %p469_p1 = scmp.ge.s32.totalorder %s688_s16, 1 }
   0x8   : > { %p107_p2 = scmp.lt.s32.totalorder %s688_s16, 3  ;;  %p745_p4 = scmp.eq.s32.totalorder %s468_s0, 0 }
   0x9   : > { %s817_s17 = smov (%p31_p0, %s29_s17), 0  ;;  %s121_s22 = sshll.u32 %s809_s1, 4  ;;  %s122_s22 = int_to_ptr.hbm [resolvable:$true] %s121_s22 }
   0xa   : > { %p739_p3 = pnand %p469_p1, %p107_p2  ;;  %s690_s23 = smov [#allocation5]  }
   0xb   : > { %s123_s24 = sshll.u32 %s690_s23, 4  ;;  %s135_s27 = sshll.u32 %s810_s2, 4  ;;  %s124_s24 = int_to_ptr.vmem [resolvable:$true] %s123_s24  ;;  %s136_s27 = int_to_ptr.hbm [resolvable:$true] %s135_s27 }
   0xc   : > { %p530_p5 = pneg %p739_p3  ;;  %s691_s28 = smov [#allocation8]  }
   0xd   : > { %s137_s29 = sshll.u32 %s691_s28, 4  ;;  %150 = sbr.rel (%p739_p3) target bundleno = 574 (0x23e), region = 28  ;;  %s138_s29 = int_to_ptr.vmem [resolvable:$true] %s137_s29 }
   0xe   : > { %p531_p6 = pnand %p745_p4, %p530_p5 }
  0x10   : > { %533 = dma.hbm_to_vmem [thread:$0]  (!%p531_p6), %s122_s22, 128, %s124_s24, [#allocation6]  }
  0x11   : > { %536 = dma.hbm_to_vmem [thread:$0]  (!%p531_p6), %s136_s27, 128, %s138_s29, [#allocation9]  }
  0x12   : > { %667 = dma.done.wait (%p745_p4), [#allocation6], 128  }
  0x13   : > { %669 = vsyncadd (%p745_p4), [#allocation6], 4294967168 }
  0x14   : > { %671 = dma.done.wait (%p745_p4), [#allocation9], 128  }
  0x15   : > { %673 = vsyncadd (%p745_p4), [#allocation9], 4294967168  ;;  %p173_p7 = scmp.eq.s32.totalorder %s680_s14, 0  ;;  %s770_s30 = sld [smem:[#allocation4]]  ;;  %v170_v0 = vld [vmem:[#allocation5] sm:$0xff]  ;;  %v775_v1 = vld [vmem:[#allocation8] sm:$0xff] }
  0x16   : > { %s692_s4 = smov 0.0   ;;  %v778_v2 = vsub.f32 %v170_v0, %v775_v1  ;;  %p476_p8 = scmp.ne.s32.totalorder %s680_s14, 0 }
  0x17   : > { %521 = sst [smem:[#allocation2]] (%p173_p7), %s692_s4 }
  0x18   : > { %522 = sst [smem:[#allocation2 + $0x1]] (%p173_p7), %s692_s4  ;;  %191 = sbr.rel (%p476_p8) target bundleno = 224 (0xe0), region = 44 }
  0x19   : > { %523 = sst [smem:[#allocation2 + $0x2]] (%p173_p7), %s692_s4 }
  0x1a   : > { %524 = sst [smem:[#allocation2 + $0x3]] (%p173_p7), %s692_s4 }
  0x1b   : > { %525 = sst [smem:[#allocation2 + $0x4]] (%p173_p7), %s692_s4  ;;  %s773_s5 = scvt.s32.f32 %s770_s30 }
  0x1c   : > { %s199_s6 = sld [smem:[#allocation2]] (!%p476_p8) }
  0x1d   : > { %226 = vadd.xlane.f32.xlu1 %v778_v2  ;;  %v192_v3 = vand.u32 2147483647, %v778_v2  ;;  %s478_s8 = sld [smem:[#allocation2 + $0x1]] }
  0x1e   : > { %s479_s10 = sld [smem:[#allocation2 + $0x2]] }
  0x1f   : > { %200 = vadd.xlane.f32.xlu0 %v192_v3  ;;  %v193_v4 = vmul.f32 0.0044444446, %v192_v3  ;;  %v195_v5 = vmul.f32 0.044444446, %v192_v3  ;;  %vm197_vm0 = vcmp.lt.f32.partialorder %v192_v3, 5.0  ;;  %s480_s11 = sld [smem:[#allocation2 + $0x3]] }
  0x21   : > { %v194_v6 = vmul.f32 %v193_v4, %v192_v3  ;;  %v477_v7 = vadd.f32 -0.11111111, %v195_v5 }
  0x23   : > { %v198_v8 = vsel %vm197_vm0, %v194_v6, %v477_v7 }
  0x25   : > { %239 = vadd.xlane.f32.xlu1 %v775_v1 }
  0x27   : > { %213 = vadd.xlane.f32.xlu0 %v198_v8 }
  0x90   : > { %v227_v9 = vpop.xlane.xlu1 %226 }
  0x91   : > { %v228_v10 = vrot.slane %v227_v9, 4 }
  0x92   : > { %v201_v11 = vpop.xlane.xlu0 %200 }
  0x93   : > { %v202_v12 = vrot.slane %v201_v11, 4  ;;  %v229_v14 = vadd.f32 %v228_v10, %v227_v9 }
  0x95   : > { %v203_v13 = vadd.f32 %v202_v12, %v201_v11  ;;  %v230_v19 = vrot.slane %v229_v14, 2 }
  0x97   : > { %v204_v15 = vrot.slane %v203_v13, 2  ;;  %v231_v27 = vadd.f32 %v230_v19, %v229_v14 }
  0x98   : > { %v240_v16 = vpop.xlane.xlu1 %239 }
  0x99   : > { %v241_v17 = vrot.slane %v240_v16, 4  ;;  %v205_v18 = vadd.f32 %v204_v15, %v203_v13  ;;  %v232_v31 = vrot.slane %v231_v27, 1 }
  0x9a   : > { %v214_v20 = vpop.xlane.xlu0 %213 }
  0x9b   : > { %v242_v21 = vadd.f32 %v241_v17, %v240_v16  ;;  %v215_v22 = vrot.slane %v214_v20, 4  ;;  %v206_v23 = vrot.slane %v205_v18, 1  ;;  %v233_v35 = vadd.f32 %v232_v31, %v231_v27 }
  0x9d   : > { %v243_v24 = vrot.slane %v242_v21, 2  ;;  %v216_v25 = vadd.f32 %v215_v22, %v214_v20  ;;  %v207_v26 = vadd.f32 %v206_v23, %v205_v18 }
  0x9f   : > { %v244_v28 = vadd.f32 %v243_v24, %v242_v21  ;;  %v217_v29 = vrot.slane %v216_v25, 2  ;;  %495 = vpush %v207_v26 }
  0xa1   : > { %v218_v30 = vadd.f32 %v217_v29, %v216_v25  ;;  %v245_v33 = vrot.slane %v244_v28, 1 }
  0xa3   : > { %v219_v32 = vrot.slane %v218_v30, 1  ;;  %v246_v36 = vadd.f32 %v245_v33, %v244_v28 }
  0xa5   : > { %v220_v34 = vadd.f32 %v219_v32, %v218_v30 }
  0xa7   : > { %497 = vpush %v220_v34 }
  0xa8   : > { %499 = vpush %v233_v35 }
  0xa9   : > { %501 = vpush %v246_v36 }
  0xd0   : > { %s496_s7 = spop %495 }
  0xd1   : > { %s209_s9 = sadd.f32 %s496_s7, %s199_s6 }
  0xd3   : > { %211 = sst [smem:[#allocation2]] %s209_s9 }
  0xd8   : > { %s498_s12 = spop %497 }
  0xd9   : > { %s222_s13 = sadd.f32 %s498_s12, %s478_s8  ;;  %s500_s18 = spop %499 }
  0xda   : > { %s235_s19 = sadd.f32 %s500_s18, %s479_s10  ;;  %s502_s20 = spop %501 }
  0xdb   : > { %224 = sst [smem:[#allocation2 + $0x1]] %s222_s13 }
  0xdc   : > { %237 = sst [smem:[#allocation2 + $0x2]] %s235_s19 }
  0xdd   : > { %s248_s21 = sadd.f32 %s502_s20, %s480_s11 }
  0xdf   : > { %250 = sst [smem:[#allocation2 + $0x3]] %s248_s21 }
  0xe0 PF: > { %p251_p9 = scmp.eq.s32.totalorder %s680_s14, 1  ;;  %p481_p10 = scmp.ne.s32.totalorder %s680_s14, 1 }
  0xe1   : > { %s482_s22 = sld [smem:[#allocation2 + $0x2]] (!%p481_p10) }
  0xe2   : > { %254 = sbr.rel (%p481_p10) target bundleno = 493 (0x1ed), region = 48  ;;  %s483_s23 = sld [smem:[#allocation2 + $0x3]] (!%p481_p10) }
  0xe3   : > { %s484_s27 = sld [smem:[#allocation2 + $0x4]] (!%p481_p10) }
  0xe7   : > { %v256_v37 = vstv %s773_s5  ;;  %v298_v48 = vlaneseq  ;;  %v307_v58 = vstv %s770_s30 }
  0xe8   : > { %572 = vrcp.f32 %v256_v37  ;;  %v268_v40 = vand.u32 2147483648, %v256_v37  ;;  %vm262_vm1 = vweird.f32 %v256_v37  ;;  %v266_v42 = vand.u32 2147483647, %v256_v37 }
  0xe9   : > { %v299_v49 = vshrl.u32 %v298_v48, 7  ;;  %v301_v50 = vand.u32 127, %v298_v48 }
  0xea   : > { %v269_v44 = vor.u32 1.1754944e-38, %v268_v40  ;;  %vm267_vm4 = vcmp.eq.f32.partialorder %v266_v42, 8.507059e+37 }
  0xeb   : > { %v305_v51 = vmul.u32 128, %v299_v49 }
  0xed   : > { %v306_v56 = vadd.s32 %v305_v51, %v301_v50 }
  0xee   : > { %v573_v38 = vpop.eup %572 }
  0xef   : > { %v258_v39 = vmul.f32 %v573_v38, %v256_v37  ;;  %vm263_vm2 = vweird.f32 %v573_v38  ;;  %vm308_vm5 = vcmp.lt.s32.totalorder %v306_v56, %v307_v58 }
  0xf0   : > { %vm264_vm3 = vmor %vm262_vm1, %vm263_vm2 }
  0xf1   : > { %v259_v41 = vsub.f32 1.0, %v258_v39 }
  0xf3   : > { %v260_v43 = vmul.f32 %v573_v38, %v259_v41 }
  0xf5   : > { %v261_v45 = vadd.f32 %v573_v38, %v260_v43 }
  0xf7   : > { %v265_v46 = vsel %vm264_vm3, %v573_v38, %v261_v45 }
  0xf8   : > { %v270_v47 = vsel %vm267_vm4, %v269_v44, %v265_v46 }
  0xf9   : > { %503 = vpush %v270_v47 }
 0x12a   : > { %s504_s24 = spop %503 }
 0x12b   : > { %s272_s25 = smul.f32 %s504_s24, %s482_s22 }
 0x12c   : > { %s290_s26 = smul.f32 %s504_s24, %s483_s23 }
 0x12d   : > { %v291_v52 = vstv %s272_s25 }
 0x12e   : > { %v292_v53 = vsub.f32 %v778_v2, %v291_v52  ;;  %v293_v54 = vstv %s290_s26 }
 0x12f   : > { %v294_v55 = vsub.f32 %v775_v1, %v293_v54 }
 0x131   : > { %v295_v57 = vmul.f32 %v294_v55, %v292_v53 }
 0x133   : > { %v296_v59 = vsub.f32 0.0, %v295_v57 }
 0x135   : > { %v297_v60 = vmax.f32 %v296_v59, 0.0 }
 0x137   : > { %v309_v61 = vsel %vm308_vm5, %v297_v60, 0.0 }
 0x138   : > { %311 = vadd.xlane.f32.xlu0 %v309_v61 }
 0x1ab   : > { %v312_v62 = vpop.xlane.xlu0 %311 }
 0x1ac   : > { %v313_v63 = vrot.slane %v312_v62, 4 }
 0x1ae   : > { %v314_v0 = vadd.f32 %v313_v63, %v312_v62 }
 0x1b0   : > { %v315_v3 = vrot.slane %v314_v0, 2 }
 0x1b2   : > { %v316_v4 = vadd.f32 %v315_v3, %v314_v0 }
 0x1b4   : > { %v317_v5 = vrot.slane %v316_v4, 1 }
 0x1b6   : > { %v318_v6 = vadd.f32 %v317_v5, %v316_v4 }
 0x1b8   : > { %505 = vpush %v318_v6 }
 0x1e9   : > { %s506_s28 = spop %505 }
 0x1ea   : > { %s320_s29 = sadd.f32 %s506_s28, %s484_s27 }
 0x1ec   : > { %322 = sst [smem:[#allocation2 + $0x4]] %s320_s29 }
 0x1ed PF: > { %326 = sbr.rel (!%p251_p9) target bundleno = 568 (0x238), region = 52  ;;  %v328_v1 = vstv (%p251_p9), %s773_s5  ;;  %s488_s30 = sadd.f32 (%p251_p9), -1.0, %s773_s5  ;;  %v693_v7 = vmov (%p251_p9), 0.01  }
 0x1ee   : > { %574 = vrcp.f32 (%p251_p9), %v328_v1  ;;  %vm334_vm6 = vweird.f32 (%p251_p9), %v328_v1  ;;  %v340_v12 = vand.u32 (%p251_p9), 2147483648, %v328_v1  ;;  %v338_v15 = vand.u32 (%p251_p9), 2147483647, %v328_v1  ;;  %s487_s14 = sld [smem:[#allocation2 + $0x4]] (%p251_p9) }
 0x1ef   : > { %v370_v2 = vstv (%p251_p9), %s488_s30  ;;  %576 = vrcp.f32 (%p251_p9), %v693_v7  ;;  %s486_s4 = sld [smem:[#allocation2 + $0x1]] (%p251_p9) }
 0x1f0   : > { %578 = vrcp.f32 (%p251_p9), %v370_v2  ;;  %vm376_vm8 = vweird.f32 (%p251_p9), %v370_v2  ;;  %v382_v17 = vand.u32 (%p251_p9), 2147483648, %v370_v2  ;;  %v380_v21 = vand.u32 (%p251_p9), 2147483647, %v370_v2  ;;  %s347_s5 = sld [smem:[#allocation2]] (%p251_p9) }
 0x1f1   : > { %v341_v22 = vor.u32 (%p251_p9), 1.1754944e-38, %v340_v12  ;;  %vm339_vm11 = vcmp.eq.f32.partialorder (%p251_p9), %v338_v15, 8.507059e+37 }
 0x1f2   : > { %v383_v26 = vor.u32 1.1754944e-38, %v382_v17  ;;  %vm381_vm14 = vcmp.eq.f32.partialorder %v380_v21, 8.507059e+37 }
 0x1f4   : > { %v575_v8 = vpop.eup %574  ;;  %s368_s6 = smul.f32 0.01, %s487_s14 }
 0x1f5   : > { %v577_v9 = vpop.eup %576  ;;  %v330_v10 = vmul.f32 %v575_v8, %v328_v1  ;;  %vm335_vm7 = vweird.f32 %v575_v8 }
 0x1f6   : > { %v579_v11 = vpop.eup %578  ;;  %v388_v13 = vmul.f32 0.01, %v577_v9  ;;  %vm336_vm10 = vmor %vm334_vm6, %vm335_vm7  ;;  %vm392_vm13 = vweird.f32 %v577_v9 }
 0x1f7   : > { %v331_v14 = vsub.f32 1.0, %v330_v10  ;;  %v372_v16 = vmul.f32 %v579_v11, %v370_v2  ;;  %vm377_vm9 = vweird.f32 %v579_v11 }
 0x1f8   : > { %v389_v18 = vsub.f32 1.0, %v388_v13  ;;  %vm378_vm12 = vmor %vm376_vm8, %vm377_vm9 }
 0x1f9   : > { %v332_v19 = vmul.f32 %v575_v8, %v331_v14  ;;  %v373_v20 = vsub.f32 1.0, %v372_v16 }
 0x1fa   : > { %v390_v23 = vmul.f32 %v577_v9, %v389_v18 }
 0x1fb   : > { %v333_v24 = vadd.f32 %v575_v8, %v332_v19  ;;  %v374_v25 = vmul.f32 %v579_v11, %v373_v20 }
 0x1fc   : > { %v391_v27 = vadd.f32 %v577_v9, %v390_v23 }
 0x1fd   : > { %v337_v28 = vsel %vm336_vm10, %v575_v8, %v333_v24  ;;  %v375_v29 = vadd.f32 %v579_v11, %v374_v25 }
 0x1fe   : > { %v342_v30 = vsel %vm339_vm11, %v341_v22, %v337_v28  ;;  %v393_v32 = vsel %vm392_vm13, %v577_v9, %v391_v27 }
 0x1ff   : > { %507 = vpush %v342_v30  ;;  %v379_v31 = vsel %vm378_vm12, %v579_v11, %v375_v29 }
 0x200   : > { %v384_v33 = vsel %vm381_vm14, %v383_v26, %v379_v31 }
 0x201   : > { %509 = vpush %v384_v33 }
 0x202   : > { %511 = vpush %v393_v32 }
 0x230   : > { %s508_s7 = spop %507 }
 0x231   : > { %s344_s8 = smul.f32 %s508_s7, %s486_s4 }
 0x232   : > { %s364_s9 = smul.f32 %s508_s7, %s347_s5  ;;  %s510_s10 = spop %509 }
 0x233   : > { %346 = sst [smem:[#allocation10]] %s344_s8  ;;  %s386_s11 = smul.f32 %s510_s10, %s368_s6 }
 0x234   : > { %366 = sst [smem:[#allocation10 + $0x1]] %s364_s9  ;;  %s512_s12 = spop %511 }
 0x235   : > { %s395_s13 = smul.f32 %s512_s12, %s386_s11 }
 0x237   : > { %397 = sst [smem:[#allocation10 + $0x2]] %s395_s13 }
 0x238 PF: > { %p541_p11 = scmp.eq.s32.totalorder %s468_s0, 1  ;;  %s404_s20 = sshll.u32 %s811_s3, 4  ;;  %s405_s20 = int_to_ptr.hbm [resolvable:$true] %s404_s20 }
 0x239   : > { %s694_s21 = smov [#allocation10]  }
 0x23a   : > { %527 = dma.smem_to_hbm (%p541_p11), %s694_s21, 16, %s405_s20, [#allocation7]  }
 0x23b   : > { %675 = dma.done.wait (%p541_p11), [#allocation7], 16  }
 0x23c   : > { %677 = vsyncadd (%p541_p11), [#allocation7], 4294967280 }
 0x23d   : > { %413 = sfence }
 0x23e PF: > { %s17_s16 = sadd.s32 1, %s688_s16   ;;  %s814_s14 = smov %s684_s15 }
 0x23f   : > { %p14_p12 = scmp.ge.s32.totalorder %s17_s16, 4   ;;  %s815_s15 = smov %s817_s17 }
 0x241   :  { %16 = sbr.rel (!%p14_p12) target bundleno = 6 (0x6), region = 92 }
 0x246   :  { %419 = vsyncpa [#allocation6], 1 }
 0x247   :  { %421 = vsyncpa [#allocation6 + $0x1], 1 }
 0x248   :  { %422 = vsyncpa [#allocation9], 1 }
 0x249   :  { %423 = vsyncpa [#allocation7], 1 }
 0x24a   :  { %425 = vsyncpa [#allocation7 + $0x1], 1 }

</bundles_post_ra>
